<compile_context>
chip_gen: v5e
topology: v5e:2x2
jax: 0.10.0
libtpu: 0.0.40
codegen_flags: <defaults>
</compile_context>

<pallas_src>
import functools
import math

import jax
import jax.numpy as jnp
from jax import lax
from jax.experimental import pallas as pl
from jax.experimental.pallas import tpu as pltpu


def _xlogx(v: float) -> float:
    return v * math.log(v) if v > 0.0 else 0.0


def _ls_loss_kernel(pred_ref, tgt_ref, out_ref,
                    m_sc, se_sc, sx_sc, xt_sc, *,
                    smooth_val: float, conf_minus_smooth: float,
                    lse_coef: float, ent_const: float,
                    ignore_index: int, v_actual: int, block_v: int,
                    need_vmask: bool):
    j = pl.program_id(1)
    nj = pl.num_programs(1)

    # Per-row-tile running state; re-initialize at the first vocab tile.
    @pl.when(j == 0)
    def _():
        m_sc[...] = jnp.full_like(m_sc, -jnp.inf)
        se_sc[...] = jnp.zeros_like(se_sc)
        sx_sc[...] = jnp.zeros_like(sx_sc)
        xt_sc[...] = jnp.zeros_like(xt_sc)

    x = pred_ref[...].astype(jnp.float32)            # (TN, TV)
    tgt = tgt_ref[...]                               # (TN, 1) int32

    col = lax.broadcasted_iota(jnp.int32, x.shape, dimension=1) + j * block_v

    if need_vmask:                                   # static: only when V % 128 != 0
        valid = col < v_actual
        x_lse = jnp.where(valid, x, -jnp.inf)        # excluded from max / exp
        x_sum = jnp.where(valid, x, 0.0)             # excluded from raw sum
    else:
        x_lse = x
        x_sum = x

    # ---- streaming logsumexp across vocab tiles (EUP exp, XLU reduce) ----
    m_new = jnp.maximum(m_sc[...], jnp.max(x_lse, axis=-1, keepdims=True))
    alpha = jnp.exp(m_sc[...] - m_new)
    se_sc[...] = alpha * se_sc[...] + jnp.sum(jnp.exp(x_lse - m_new),
                                              axis=-1, keepdims=True)
    m_sc[...] = m_new

    # ---- running raw-logit sum and logit at the target column -----------
    sx_sc[...] += jnp.sum(x_sum, axis=-1, keepdims=True)
    xt_sc[...] += jnp.sum(jnp.where(col == tgt, x, 0.0), axis=-1, keepdims=True)

    # ---- finalize this row tile at the last vocab step -------------------
    @pl.when(j == nj - 1)
    def _():
        lse = m_sc[...] + jnp.log(se_sc[...])
        per_row = (ent_const
                   - smooth_val * sx_sc[...]
                   - conf_minus_smooth * xt_sc[...]
                   + lse_coef * lse)                                 # (TN, 1)
        keep = (tgt != ignore_index).astype(jnp.float32)             # (TN, 1)
        out_ref[...] = per_row * keep


def label_smoothing_loss(pred, target, *, label_smoothing, tgt_vocab_size,
                         ignore_index=0, block_rows=256, max_block_v=2048):
    """pred: (N, V) float logits, target: (N,) int labels. Returns scalar loss."""
    N, V = pred.shape

    smooth_val = label_smoothing / (tgt_vocab_size - 2)
    confidence = 1.0 - label_smoothing
    ent_const = (V - 1) * _xlogx(smooth_val) + _xlogx(confidence)
    lse_coef = smooth_val * (V - 1) + confidence

    # ---- vocab tiling: pad lanes to 128, pick the largest tile <= cap ----
    vp = ((V + 127) // 128) * 128
    if vp <= max_block_v:
        tv = vp
    else:
        tv = 128
        for cand in (4096, 2048, 1024, 512, 256, 128):
            if cand <= max_block_v and vp % cand == 0:
                tv = cand
                break
    need_vmask = (vp != V)
    if need_vmask:
        # TODO(synk): for very large unaligned vocabularies this pad is a full
        # HBM copy; a custom index_map with a ragged last tile would avoid it.
        pred = jnp.pad(pred, ((0, 0), (0, vp - V)))

    # ---- row tiling: multiple of 8 sublanes; pad rows with ignore_index ---
    tn = max(8, (min(block_rows, N) // 8) * 8)
    n_pad = (-N) % tn
    if n_pad:
        pred = jnp.pad(pred, ((0, n_pad), (0, 0)))
        target = jnp.concatenate(
            [target, jnp.full((n_pad,), ignore_index, target.dtype)])
    n_padded = N + n_pad
    tgt2d = target.astype(jnp.int32).reshape(n_padded, 1)

    grid = (n_padded // tn, vp // tv)

    kernel = functools.partial(
        _ls_loss_kernel,
        smooth_val=float(smooth_val),
        conf_minus_smooth=float(confidence - smooth_val),
        lse_coef=float(lse_coef),
        ent_const=float(ent_const),
        ignore_index=int(ignore_index),
        v_actual=int(V),
        block_v=int(tv),
        need_vmask=bool(need_vmask),
    )

    per_row = pl.pallas_call(
        kernel,
        out_shape=jax.ShapeDtypeStruct((n_padded, 1), jnp.float32),
        grid_spec=pltpu.PrefetchScalarGridSpec(
            num_scalar_prefetch=0,
            grid=grid,
            in_specs=[
                pl.BlockSpec((tn, tv), lambda i, j: (i, j)),   # logits tile
                pl.BlockSpec((tn, 1), lambda i, j: (i, 0)),    # targets (resident over vocab)
            ],
            out_specs=pl.BlockSpec((tn, 1), lambda i, j: (i, 0)),
            scratch_shapes=[pltpu.VMEM((tn, 1), jnp.float32)] * 4,
        ),
        compiler_params=pltpu.CompilerParams(
            dimension_semantics=("parallel", "arbitrary")),
    )(pred, tgt2d)

    # KLDivLoss(reduction='batchmean') divides by the ORIGINAL row count;
    # padded / ignored rows are exactly zero.
    return jnp.sum(per_row) / N


def reference_loss(pred, target, label_smoothing, tgt_vocab_size, ignore_index=0):
    """Direct JAX port of the PyTorch forward (for verification)."""
    N, V = pred.shape
    logp = jax.nn.log_softmax(pred.astype(jnp.float32), axis=-1)
    s = label_smoothing / (tgt_vocab_size - 2)
    conf = 1.0 - label_smoothing
    true_dist = jnp.full((N, V), s, dtype=jnp.float32)
    ignore = target == ignore_index
    tgt = jnp.where(ignore, 0, target)
    true_dist = true_dist.at[jnp.arange(N), tgt].set(conf)
    true_dist = jnp.where(ignore[:, None], 0.0, true_dist)
    safe = jnp.where(true_dist > 0.0, true_dist, 1.0)
    kl = jnp.where(true_dist > 0.0, true_dist * (jnp.log(safe) - logp), 0.0)
    return jnp.sum(kl) / N


if __name__ == "__main__":
    label_smoothing = 0.1
    ignore_index = 0
    key = jax.random.PRNGKey(0)
    k1, k2, k3, k4 = jax.random.split(key, 4)

    # Test 1: aligned vocab; tiny tiles force a (2, 4) grid so the streaming
    # logsumexp across vocab tiles and multi-row-tile path are exercised.
    B, S, V = 2, 8, 512
    N = B * S
    pred = jax.random.normal(k1, (N, V), dtype=jnp.float32)
    target = jax.random.randint(k2, (N,), 1, V, dtype=jnp.int32)
    target = target.at[jnp.array([0, 5, 11])].set(ignore_index)

    loss = label_smoothing_loss(
        pred, target, label_smoothing=label_smoothing, tgt_vocab_size=V,
        ignore_index=ignore_index, block_rows=8, max_block_v=128)
    loss = jax.block_until_ready(loss)
    ref = reference_loss(pred, target, label_smoothing, V, ignore_index)
    assert loss.shape == ()
    assert jnp.allclose(loss, ref, atol=2e-4, rtol=2e-4), (loss, ref)

    # Test 2: unaligned vocab (lane padding + in-kernel mask) and row padding.
    N2, V2 = 15, 500
    pred2 = jax.random.normal(k3, (N2, V2), dtype=jnp.float32)
    target2 = jax.random.randint(k4, (N2,), 1, V2, dtype=jnp.int32)
    target2 = target2.at[jnp.array([2, 7])].set(ignore_index)

    loss2 = label_smoothing_loss(
        pred2, target2, label_smoothing=label_smoothing, tgt_vocab_size=V2,
        ignore_index=ignore_index, block_rows=8, max_block_v=128)
    loss2 = jax.block_until_ready(loss2)
    ref2 = reference_loss(pred2, target2, label_smoothing, V2, ignore_index)
    assert jnp.allclose(loss2, ref2, atol=2e-4, rtol=2e-4), (loss2, ref2)

    print("KERNEL_OK")
</pallas_src>

<mosaic_0001>
module attributes {stable_mosaic.version = 11 : i64} {
  func.func @_ls_loss_kernel(%arg0: i32, %arg1: i32, %arg2: memref<8x128xf32, #tpu.memory_space<vmem>>, %arg3: memref<8x1xi32, #tpu.memory_space<vmem>>, %arg4: memref<8x1xf32, #tpu.memory_space<vmem>>, %arg5: memref<8x1xf32, #tpu.memory_space<vmem>>, %arg6: memref<8x1xf32, #tpu.memory_space<vmem>>, %arg7: memref<8x1xf32, #tpu.memory_space<vmem>>, %arg8: memref<8x1xf32, #tpu.memory_space<vmem>>) attributes {dimension_semantics = [#tpu.dimension_semantics<parallel>, #tpu.dimension_semantics<arbitrary>], iteration_bounds = array<i64: 2, 4>, scalar_prefetch = 0 : i64, scratch_operands = 4 : i64, tpu.core_type = #tpu.core_type<tc>, window_params = [{transform_indices = @transform_0, window_bounds = array<i64: 8, 128>}, {transform_indices = @transform_1, window_bounds = array<i64: 8, 1>}, {transform_indices = @transform_2, window_bounds = array<i64: 8, 1>}]} {
    %c0_i32 = arith.constant 0 : i32
    %0 = arith.cmpi eq, %arg1, %c0_i32 : i32
    %1 = arith.extui %0 : i1 to i32
    %c0_i32_0 = arith.constant 0 : i32
    %2 = arith.cmpi ne, %1, %c0_i32_0 : i32
    scf.if %2 {
      %cst_27 = arith.constant 0xFF800000 : f32
      %43 = vector.broadcast %cst_27 : f32 to vector<8x1xf32>
      %c0_28 = arith.constant 0 : index
      %c0_29 = arith.constant 0 : index
      %44 = vector.load %arg5[%c0_28, %c0_29] : memref<8x1xf32, #tpu.memory_space<vmem>>, vector<8x1xf32>
      tpu.vector_store %arg5[%c0_28, %c0_29], %43 {strides = array<i32>} : memref<8x1xf32, #tpu.memory_space<vmem>>, vector<8x1xf32>,
      %cst_30 = arith.constant 0.000000e+00 : f32
      %45 = vector.broadcast %cst_30 : f32 to vector<8x1xf32>
      %c0_31 = arith.constant 0 : index
      %c0_32 = arith.constant 0 : index
      %46 = vector.load %arg6[%c0_31, %c0_32] : memref<8x1xf32, #tpu.memory_space<vmem>>, vector<8x1xf32>
      tpu.vector_store %arg6[%c0_31, %c0_32], %45 {strides = array<i32>} : memref<8x1xf32, #tpu.memory_space<vmem>>, vector<8x1xf32>,
      %cst_33 = arith.constant 0.000000e+00 : f32
      %47 = vector.broadcast %cst_33 : f32 to vector<8x1xf32>
      %c0_34 = arith.constant 0 : index
      %c0_35 = arith.constant 0 : index
      %48 = vector.load %arg7[%c0_34, %c0_35] : memref<8x1xf32, #tpu.memory_space<vmem>>, vector<8x1xf32>
      tpu.vector_store %arg7[%c0_34, %c0_35], %47 {strides = array<i32>} : memref<8x1xf32, #tpu.memory_space<vmem>>, vector<8x1xf32>,
      %cst_36 = arith.constant 0.000000e+00 : f32
      %49 = vector.broadcast %cst_36 : f32 to vector<8x1xf32>
      %c0_37 = arith.constant 0 : index
      %c0_38 = arith.constant 0 : index
      %50 = vector.load %arg8[%c0_37, %c0_38] : memref<8x1xf32, #tpu.memory_space<vmem>>, vector<8x1xf32>
      tpu.vector_store %arg8[%c0_37, %c0_38], %49 {strides = array<i32>} : memref<8x1xf32, #tpu.memory_space<vmem>>, vector<8x1xf32>,
    } else {
    }
    %c0 = arith.constant 0 : index
    %c0_1 = arith.constant 0 : index
    %3 = vector.load %arg2[%c0, %c0_1] : memref<8x128xf32, #tpu.memory_space<vmem>>, vector<8x128xf32>
    %c0_2 = arith.constant 0 : index
    %c0_3 = arith.constant 0 : index
    %4 = vector.load %arg3[%c0_2, %c0_3] : memref<8x1xi32, #tpu.memory_space<vmem>>, vector<8x1xi32>
    %5 = tpu.iota {dimensions = array<i32: 1>} : vector<8x128xi32>
    %c128_i32 = arith.constant 128 : i32
    %6 = arith.muli %arg1, %c128_i32 : i32
    %7 = vector.broadcast %6 : i32 to vector<8x128xi32>
    %8 = arith.addi %5, %7 : vector<8x128xi32>
    %c0_4 = arith.constant 0 : index
    %c0_5 = arith.constant 0 : index
    %9 = vector.load %arg5[%c0_4, %c0_5] : memref<8x1xf32, #tpu.memory_space<vmem>>, vector<8x1xf32>
    %cst = arith.constant dense<0xFF800000> : vector<8xf32>
    %10 = vector.multi_reduction <maximumf>, %3, %cst [1] : vector<8x128xf32> to vector<8xf32>
    %11 = vector.shape_cast %10 : vector<8xf32> to vector<8x1xf32>
    %12 = arith.maximumf %9, %11 : vector<8x1xf32>
    %c0_6 = arith.constant 0 : index
    %c0_7 = arith.constant 0 : index
    %13 = vector.load %arg5[%c0_6, %c0_7] : memref<8x1xf32, #tpu.memory_space<vmem>>, vector<8x1xf32>
    %14 = arith.subf %13, %12 : vector<8x1xf32>
    %15 = math.exp %14 : vector<8x1xf32>
    %c0_8 = arith.constant 0 : index
    %c0_9 = arith.constant 0 : index
    %16 = vector.load %arg6[%c0_8, %c0_9] : memref<8x1xf32, #tpu.memory_space<vmem>>, vector<8x1xf32>
    %17 = arith.mulf %15, %16 : vector<8x1xf32>
    %18 = vector.broadcast %12 : vector<8x1xf32> to vector<8x128xf32>
    %19 = arith.subf %3, %18 : vector<8x128xf32>
    %20 = math.exp %19 : vector<8x128xf32>
    %cst_10 = arith.constant dense<0.000000e+00> : vector<8xf32>
    %21 = vector.multi_reduction <add>, %20, %cst_10 [1] : vector<8x128xf32> to vector<8xf32>
    %22 = vector.shape_cast %21 : vector<8xf32> to vector<8x1xf32>
    %23 = arith.addf %17, %22 : vector<8x1xf32>
    %c0_11 = arith.constant 0 : index
    %c0_12 = arith.constant 0 : index
    %24 = vector.load %arg6[%c0_11, %c0_12] : memref<8x1xf32, #tpu.memory_space<vmem>>, vector<8x1xf32>
    tpu.vector_store %arg6[%c0_11, %c0_12], %23 {strides = array<i32>} : memref<8x1xf32, #tpu.memory_space<vmem>>, vector<8x1xf32>,
    %c0_13 = arith.constant 0 : index
    %c0_14 = arith.constant 0 : index
    %25 = vector.load %arg5[%c0_13, %c0_14] : memref<8x1xf32, #tpu.memory_space<vmem>>, vector<8x1xf32>
    tpu.vector_store %arg5[%c0_13, %c0_14], %12 {strides = array<i32>} : memref<8x1xf32, #tpu.memory_space<vmem>>, vector<8x1xf32>,
    %c0_15 = arith.constant 0 : index
    %c0_16 = arith.constant 0 : index
    %26 = vector.load %arg7[%c0_15, %c0_16] : memref<8x1xf32, #tpu.memory_space<vmem>>, vector<8x1xf32>
    %cst_17 = arith.constant dense<0.000000e+00> : vector<8xf32>
    %27 = vector.multi_reduction <add>, %3, %cst_17 [1] : vector<8x128xf32> to vector<8xf32>
    %28 = vector.shape_cast %27 : vector<8xf32> to vector<8x1xf32>
    %29 = arith.addf %26, %28 : vector<8x1xf32>
    %c0_18 = arith.constant 0 : index
    %c0_19 = arith.constant 0 : index
    %30 = vector.load %arg7[%c0_18, %c0_19] : memref<8x1xf32, #tpu.memory_space<vmem>>, vector<8x1xf32>
    tpu.vector_store %arg7[%c0_18, %c0_19], %29 {strides = array<i32>} : memref<8x1xf32, #tpu.memory_space<vmem>>, vector<8x1xf32>,
    %c0_20 = arith.constant 0 : index
    %c0_21 = arith.constant 0 : index
    %31 = vector.load %arg8[%c0_20, %c0_21] : memref<8x1xf32, #tpu.memory_space<vmem>>, vector<8x1xf32>
    %32 = vector.broadcast %4 : vector<8x1xi32> to vector<8x128xi32>
    %33 = arith.cmpi eq, %8, %32 : vector<8x128xi32>
    %cst_22 = arith.constant 0.000000e+00 : f32
    %34 = vector.broadcast %cst_22 : f32 to vector<8x128xf32>
    %35 = arith.select %33, %3, %34 : vector<8x128xi1>, vector<8x128xf32>
    %cst_23 = arith.constant dense<0.000000e+00> : vector<8xf32>
    %36 = vector.multi_reduction <add>, %35, %cst_23 [1] : vector<8x128xf32> to vector<8xf32>
    %37 = vector.shape_cast %36 : vector<8xf32> to vector<8x1xf32>
    %38 = arith.addf %31, %37 : vector<8x1xf32>
    %c0_24 = arith.constant 0 : index
    %c0_25 = arith.constant 0 : index
    %39 = vector.load %arg8[%c0_24, %c0_25] : memref<8x1xf32, #tpu.memory_space<vmem>>, vector<8x1xf32>
    tpu.vector_store %arg8[%c0_24, %c0_25], %38 {strides = array<i32>} : memref<8x1xf32, #tpu.memory_space<vmem>>, vector<8x1xf32>,
    %c3_i32 = arith.constant 3 : i32
    %40 = arith.cmpi eq, %arg1, %c3_i32 : i32
    %41 = arith.extui %40 : i1 to i32
    %c0_i32_26 = arith.constant 0 : i32
    %42 = arith.cmpi ne, %41, %c0_i32_26 : i32
    scf.if %42 {
      %c0_27 = arith.constant 0 : index
      %c0_28 = arith.constant 0 : index
      %43 = vector.load %arg5[%c0_27, %c0_28] : memref<8x1xf32, #tpu.memory_space<vmem>>, vector<8x1xf32>
      %c0_29 = arith.constant 0 : index
      %c0_30 = arith.constant 0 : index
      %44 = vector.load %arg6[%c0_29, %c0_30] : memref<8x1xf32, #tpu.memory_space<vmem>>, vector<8x1xf32>
      %45 = math.log %44 : vector<8x1xf32>
      %46 = arith.addf %43, %45 : vector<8x1xf32>
      %c0_31 = arith.constant 0 : index
      %c0_32 = arith.constant 0 : index
      %47 = vector.load %arg7[%c0_31, %c0_32] : memref<8x1xf32, #tpu.memory_space<vmem>>, vector<8x1xf32>
      %cst_33 = arith.constant 1.96078428E-4 : f32
      %48 = vector.broadcast %cst_33 : f32 to vector<8x1xf32>
      %49 = arith.mulf %48, %47 : vector<8x1xf32>
      %cst_34 = arith.constant -0.950197994 : f32
      %50 = vector.broadcast %cst_34 : f32 to vector<8x1xf32>
      %51 = arith.subf %50, %49 : vector<8x1xf32>
      %c0_35 = arith.constant 0 : index
      %c0_36 = arith.constant 0 : index
      %52 = vector.load %arg8[%c0_35, %c0_36] : memref<8x1xf32, #tpu.memory_space<vmem>>, vector<8x1xf32>
      %cst_37 = arith.constant 0.899803936 : f32
      %53 = vector.broadcast %cst_37 : f32 to vector<8x1xf32>
      %54 = arith.mulf %53, %52 : vector<8x1xf32>
      %55 = arith.subf %51, %54 : vector<8x1xf32>
      %cst_38 = arith.constant 1.0001961 : f32
      %56 = vector.broadcast %cst_38 : f32 to vector<8x1xf32>
      %57 = arith.mulf %56, %46 : vector<8x1xf32>
      %58 = arith.addf %55, %57 : vector<8x1xf32>
      %c0_i32_39 = arith.constant 0 : i32
      %59 = vector.broadcast %c0_i32_39 : i32 to vector<8x1xi32>
      %60 = arith.cmpi ne, %4, %59 : vector<8x1xi32>
      %61 = arith.extui %60 : vector<8x1xi1> to vector<8x1xi32>
      %62 = arith.sitofp %61 : vector<8x1xi32> to vector<8x1xf32>
      %63 = arith.mulf %58, %62 : vector<8x1xf32>
      %c0_40 = arith.constant 0 : index
      %c0_41 = arith.constant 0 : index
      %64 = vector.load %arg4[%c0_40, %c0_41] : memref<8x1xf32, #tpu.memory_space<vmem>>, vector<8x1xf32>
      tpu.vector_store %arg4[%c0_40, %c0_41], %63 {strides = array<i32>} : memref<8x1xf32, #tpu.memory_space<vmem>>, vector<8x1xf32>,
    } else {
    }
    return
  }
  func.func @transform_0(%arg0: i32, %arg1: i32) -> (i32, i32) {
    %c0_i32 = arith.constant 0 : i32
    return %arg0, %arg1 : i32, i32
  }
  func.func @transform_1(%arg0: i32, %arg1: i32) -> (i32, i32) {
    %c0_i32 = arith.constant 0 : i32
    %c0_i32_0 = arith.constant 0 : i32
    return %arg0, %c0_i32 : i32, i32
  }
  func.func @transform_2(%arg0: i32, %arg1: i32) -> (i32, i32) {
    %c0_i32 = arith.constant 0 : i32
    %c0_i32_0 = arith.constant 0 : i32
    return %arg0, %c0_i32 : i32, i32
  }
}

</mosaic_0001>

<bundles_post_ra>
// kernel: tpu_custom_call.1
= control target key start
LH: loop header
LB: loop body
LE: loop exit
PB: predicated region body
PF: predicated region fallthrough
CT: control target
= control target key end

     0   :  { %7 = vsyncpa [#allocation7], 0  ;;  %s704_s0 = inlined_call_operand.hbm [shape: f32[16,512], index: 0, kind: input, shape index: {}]   ;;  %s705_s1 = inlined_call_operand.vmem [shape: s32[16,1], index: 1, kind: input, shape index: {}]   ;;  %s706_s2 = inlined_call_operand.vmem [shape: f32[16,1], index: 2, kind: output, shape index: {}]  }
   0x1   :  { %9 = vsyncpa [#allocation7 + $0x1], 0  ;;  %s577_s9 = smov 0   ;;  %s579_s10 = smov 0  }
   0x2   :  { %s581_s11 = smov 0   ;;  %s583_s12 = smov 0  }
   0x3   :  { %s585_s13 = smov 0   ;;  %s587_s14 = smov 0  }
   0x4   :  { %s589_s15 = smov 0   ;;  %s591_s16 = smov 0  }
   0x5 LB: > { %s360_s17 = sadd.s32 4294967295, %s556_s16   ;;  %s24_s18 = sadd.s32 1, %s548_s14  ;;  %s556_s16 = sphi %s591_s16, %s15_s16   ;;  %s552_s15 = sphi %s589_s15, %s715_s15   ;;  %s548_s14 = sphi %s587_s14, %s714_s14   ;;  %s544_s13 = sphi %s585_s13, %s713_s13   ;;  %s540_s12 = sphi %s583_s12, %s712_s12   ;;  %s536_s11 = sphi %s581_s11, %s711_s11   ;;  %s532_s10 = sphi %s579_s10, %s710_s10   ;;  %s528_s9 = sphi %s577_s9, %s709_s9  }
   0x6   : > { %p25_p0 = scmp.ge.s32.totalorder %s24_s18, 4  ;;  %s27_s19 = sadd.s32 1, %s552_s15 }
   0x7   : > { %s36_s20 = sadd.s32 1, %s536_s11  ;;  %p43_p1 = scmp.ne.s32.totalorder %s536_s11, %s532_s10 }
   0x8   : > { %s717_s18 = smov (%p25_p0, %s24_s18), 0  ;;  %s719_s19 = smov (!%p25_p0, %s27_s19), %s552_s15 }
   0x9   : > { %s32_s21 = ssub.s32 %s548_s14, %s717_s18  ;;  %p44_p2 = scmp.eq.s32.totalorder %s556_s16, 0 }
   0xa   : > { %p29_p3 = scmp.ge.s32.totalorder %s719_s19, 2  ;;  %p49_p4 = scmp.ne.s32.totalorder %s532_s10, %s528_s9 }
   0xb   : > { %p628_p5 = por %p44_p2, %p43_p1  ;;  %p50_p6 = scmp.eq.s32.totalorder %s360_s17, 0 }
   0xc   : > { %s721_s19 = smov (%p29_p3, %s719_s19), 0  ;;  %p383_p8 = scmp.lt.s32.totalorder %s556_s16, 8 }
   0xd   : > { %p634_p7 = por %p50_p6, %p49_p4  ;;  %s31_s24 = ssub.s32 %s552_s15, %s721_s19 }
   0xe   : > { %s33_s25 = sor.u32 %s32_s21, %s31_s24  ;;  %s125_s26 = sand.u32 1, %s536_s11  }
   0xf   : > { %p34_p9 = scmp.eq.s32.totalorder %s33_s25, 0  ;;  %s364_s27 = sshll.u32 %s125_s26, 3 }
  0x10   : > { %s365_s28 = sshll.u32 %s552_s15, 2  ;;  %s129_s4 = scalar_lea.vmem [#allocation6], %s364_s27 }
  0x11   : > { %s644_s29 = scalar_select %p34_p9, %s536_s11, %s36_s20  }
  0x12   : > { %s133_s30 = sadd.s32 %s548_s14, %s365_s28  ;;  %s139_s5 = sshll.u32 %s129_s4, 4  ;;  %s140_s5 = int_to_ptr.vmem [resolvable:$true] %s139_s5 }
  0x13   : > { %s366_s3 = sshll.u32 %s133_s30, 3  ;;  %p380_p10 = pnand %p383_p8, %p628_p5 }
  0x14   : > { %s135_s8 = scalar_lea.hbm %s704_s0, %s366_s3  ;;  %p367_p11 = scmp.ge.s32.totalorder %s556_s16, 1 }
  0x15   : > { %s137_s9 = sshll.u32 %s135_s8, 4  ;;  %p151_p12 = scmp.lt.s32.totalorder %s556_s16, 9  ;;  %s138_s9 = int_to_ptr.hbm [resolvable:$true] %s137_s9 }
  0x16   : > { %s126_s17 = scalar_lea.sflag [#allocation7], %s125_s26 }
  0x17   : > { %382 = dma.hbm_to_vmem [thread:$0]  (!%p380_p10), %s138_s9, 128, %s140_s5, %s126_s17  }
  0x18   : > { %p152_p13 = pnand %p367_p11, %p151_p12 }
  0x19   : > { %s157_s20 = sand.u32 (!%p152_p13), 1, %s532_s10  }
  0x1a   : > { %155 = sbr.rel (%p152_p13) target bundleno = 433 (0x1b1), region = 28  ;;  %s368_s21 = sshll.u32 (!%p152_p13), %s157_s20, 3 }
  0x1b   : > { %s158_s24 = scalar_lea.sflag (!%p152_p13), [#allocation7], %s157_s20  ;;  %s161_s25 = scalar_lea.vmem (!%p152_p13), [#allocation6], %s368_s21 }
  0x1f   : > { %523 = dma.done.wait (%p634_p7), %s158_s24, 128  }
  0x20   : > { %525 = vsyncadd (%p634_p7), %s158_s24, 4294967168  ;;  %p186_p0 = scmp.lt.s32.totalorder %s544_s13, 1  ;;  %p371_p1 = scmp.ne.s32.totalorder %s540_s12, 0 }
  0x22   : > { %s723_s13 = smov (!%p186_p0, %s544_s13), 1  ;;  %197 = sbr.rel (%p371_p1) target bundleno = 44 (0x2c), region = 36 }
  0x23   : > { %s369_s22 = sshll.u32 %s723_s13, 3 }
  0x24   : > { %s189_s28 = scalar_lea.vmem %s705_s1, %s369_s22  ;;  %s669_s4 = scalar_lea.vmem %s706_s2, %s369_s22 }
  0x27   : > { %vm198_vm0 = vcmask 7168   ;;  %v558_v0 = vmov -inf   ;;  %v559_v1 = vmov 0.0  }
  0x28   : > { %199 = vst.msk [vmem:[#allocation2] sm:$0xff] %vm198_vm0, %v558_v0 }
  0x29   : > { %200 = vst.msk [vmem:[#allocation3] sm:$0xff] %vm198_vm0, %v559_v1 }
  0x2a   : > { %201 = vst.msk [vmem:[#allocation4] sm:$0xff] %vm198_vm0, %v559_v1 }
  0x2b   : > { %202 = vst.msk [vmem:[#allocation5] sm:$0xff] %vm198_vm0, %v559_v1 }
  0x2c PF: > { %v203_v2 = vld [vmem:[%s161_s25] sm:$0xff]  ;;  %v560_v3 = vmov 0   ;;  %vm230_vm1 = vcmask 7168   ;;  %s372_s13 = sshll.u32 %s540_s12, 7  ;;  %v205_v9 = vlaneseq  ;;  %p373_p2 = scmp.ne.s32.totalorder %s540_s12, 3 }
  0x2d   : > { %211 = vmax.xlane.f32.xlu0 %v203_v2  ;;  %234 = vadd.xlane.f32.xlu2 %v203_v2  ;;  %v204_v4 = vld [vmem:[%s189_s28] sm:$0xff]  ;;  %v208_v10 = vstv %s372_s13 }
  0x2e   : > { %452 = vset.pattern.permute.xlu0 %v560_v3  ;;  %453 = vset.pattern.permute.xlu1 %v560_v3  ;;  %v206_v11 = vand.u32 127, %v205_v9 }
  0x2f   : > { %240 = vperm.xlu1 %453, %v204_v4   ;;  %v210_v5 = vld [vmem:[#allocation2] sm:$0xff] }
  0x30   : > { %v209_v13 = vadd.s32 %v208_v10, %v206_v11  ;;  %v217_v27 = vld [vmem:[#allocation3] sm:$0xff] }
  0x31   : > { %v233_v15 = vld [vmem:[#allocation4] sm:$0xff] }
  0x32   : > { %v238_v22 = vld [vmem:[#allocation5] sm:$0xff] }
  0xa0   : > { %v212_v6 = vpop.xlane.xlu0 %211  ;;  %v235_v16 = vpop.xlane.xlu2 %234 }
  0xa1   : > { %v213_v7 = vmax.f32 %v210_v5, %v212_v6  ;;  %v241_v12 = vpop.permute.xlu1 %240  ;;  %v236_v17 = vadd.f32 %v235_v16, %v233_v15 }
  0xa2   : > { %vm242_vm2 = vcmp.eq.s32.totalorder %v209_v13, %v241_v12 }
  0xa3   : > { %v214_v8 = vsub.f32 %v210_v5, %v213_v7  ;;  %232 = vst.msk [vmem:[#allocation2] sm:$0xff] %vm230_vm1, %v213_v7  ;;  %221 = vperm.xlu0 %452, %v213_v7   ;;  %v243_v14 = vsel %vm242_vm2, %v203_v2, 0.0 }
  0xa4   : > { %244 = vadd.xlane.f32.xlu2 %v243_v14  ;;  %237 = vst.msk [vmem:[#allocation4] sm:$0xff] %vm230_vm1, %v236_v17 }
  0xa5   : > { %v215_v25 = vmul.f32 1.442695, %v214_v8 }
 0x115   : > { %v222_v18 = vpop.permute.xlu0 %221 }
 0x116   : > { %v224_v19 = vsub.f32 %v203_v2, %v222_v18 }
 0x117   : > { %v245_v23 = vpop.xlane.xlu2 %244 }
 0x118   : > { %v225_v20 = vmul.f32 1.442695, %v224_v19  ;;  %v246_v24 = vadd.f32 %v245_v23, %v238_v22 }
 0x11a   : > { %454 = vpow2.f32 %v225_v20  ;;  %247 = vst.msk [vmem:[#allocation5] sm:$0xff] %vm230_vm1, %v246_v24 }
 0x11b   : > { %456 = vpow2.f32 %v215_v25 }
 0x120   : > { %v455_v21 = vpop.eup %454 }
 0x121   : > { %227 = vadd.xlane.f32.xlu1 %v455_v21  ;;  %v457_v26 = vpop.eup %456 }
 0x122   : > { %v218_v28 = vmul.f32 %v457_v26, %v217_v27 }
 0x193   : > { %251 = sbr.rel (%p373_p2) target bundleno = 433 (0x1b1), region = 40 }
 0x194   : > { %v228_v29 = vpop.xlane.xlu1 %227 }
 0x195   : > { %v229_v30 = vadd.f32 %v228_v29, %v218_v28 }
 0x197   : > { %231 = vst.msk [vmem:[#allocation3] sm:$0xff] %vm230_vm1, %v229_v30 }
 0x198   : > { %v257_v32 = vld [vmem:[#allocation4] sm:$0xff]  ;;  %v260_v34 = vld [vmem:[#allocation5] sm:$0xff]  ;;  %v252_v38 = vld [vmem:[#allocation2] sm:$0xff]  ;;  %vm265_vm3 = vcmp.ne.s32.totalorder %v204_v4, 0  ;;  %v561_v43 = vmov 0.0  }
 0x199   : > { %v258_v33 = vmul.f32 0.00019607843, %v257_v32  ;;  %v261_v36 = vmul.f32 0.89980394, %v260_v34  ;;  %v374_v44 = vsel %vm265_vm3, 1.0, %v561_v43 }
 0x19b   : > { %v259_v35 = vsub.f32 -0.950198, %v258_v33 }
 0x19d   : > { %v262_v41 = vsub.f32 %v259_v35, %v261_v36 }
 0x19e   : > { %v253_v31 = vld [vmem:[#allocation3] sm:$0xff] }
 0x19f   : > { %458 = vlog2.f32 %v253_v31 }
 0x1a5   : > { %v459_v37 = vpop.eup %458 }
 0x1a6   : > { %v255_v39 = vmul.f32 0.6931472, %v459_v37 }
 0x1a8   : > { %v256_v40 = vadd.f32 %v255_v39, %v252_v38 }
 0x1aa   : > { %v263_v42 = vmul.f32 1.0001961, %v256_v40 }
 0x1ac   : > { %v264_v45 = vadd.f32 %v263_v42, %v262_v41 }
 0x1ae   : > { %v268_v46 = vmul.f32 %v374_v44, %v264_v45 }
 0x1b0   : > { %269 = vst.msk [vmem:[%s669_s4] sm:$0xff] %vm230_vm1, %v268_v46 }
 0x1b1 PF: > { %s15_s16 = sadd.s32 1, %s556_s16   ;;  %s709_s9 = smov %s532_s10 }
 0x1b2   : > { %p12_p3 = scmp.ge.s32.totalorder %s15_s16, 10   ;;  %s710_s10 = smov %s536_s11 }
 0x1b3   : > { %s711_s11 = smov %s644_s29  ;;  %s712_s12 = smov %s548_s14 }
 0x1b4   : > { %s713_s13 = smov %s552_s15  ;;  %s714_s14 = smov %s717_s18 }
 0x1b5   : > { %s715_s15 = smov %s721_s19  ;;  %14 = sbr.rel (!%p12_p3) target bundleno = 5 (0x5), region = 79 }
 0x1ba   :  { %289 = vsyncpa [#allocation7], 1 }
 0x1bb   :  { %291 = vsyncpa [#allocation7 + $0x1], 1 }

</bundles_post_ra>
